<compile_context>
chip_gen: v7x
topology: tpu7x:2x2x1
jax: 0.10.0
libtpu: 0.0.40
codegen_flags: <defaults>
</compile_context>

<pallas_src>
import functools
import math

import jax
import jax.numpy as jnp
from jax.experimental import pallas as pl
from jax.experimental.pallas import tpu as pltpu


_MASK = -1.0e30  # finite "minus infinity" bias for padded key rows


def _round_up(x: int, m: int) -> int:
    return ((x + m - 1) // m) * m


# ----------------------------------------------------------------------------
# Kernel 1: node projection  (values v = x @ W, attention scores s = x @ Wa)
# ----------------------------------------------------------------------------
def gat_project_kernel(x_ref, w_ref, wa_ref, v_ref, s_ref):
    x = x_ref[...]                                     # [blk, f_in] f32
    # Values: bf16 operands on the MXU, f32 accumulate, bf16 storage.
    v_ref[...] = jnp.dot(x.astype(jnp.bfloat16), w_ref[...],
                         preferred_element_type=jnp.float32).astype(v_ref.dtype)
    # Attention scores [s1 | s2] for all heads in one matmul (stays f32: feeds exp).
    s_ref[...] = jnp.dot(x, wa_ref[...], preferred_element_type=jnp.float32)
    # TODO(synk): tile over f_in with a VMEM accumulator for very wide inputs
    # (thousands of features) to stay inside v7x's smaller VMEM.


# ----------------------------------------------------------------------------
# Kernel 2: flash-style attention, transposed tiles ([blk_k, blk_q] logits)
# ----------------------------------------------------------------------------
def gat_attention_kernel(s1t_ref, s2_ref, vt_ref, o_ref, m_sc, l_sc, acc_sc, *,
                         n_heads, out_features, blk_k, alpha, n_valid, n_pad,
                         v_resident):
    F = out_features
    ki = pl.program_id(1)

    @pl.when(ki == 0)
    def _init():
        m_sc[...] = jnp.full(m_sc.shape, -jnp.inf, m_sc.dtype)
        l_sc[...] = jnp.zeros(l_sc.shape, l_sc.dtype)
        acc_sc[...] = jnp.zeros(acc_sc.shape, acc_sc.dtype)

    s1t = s1t_ref[...]                                 # [H, blk_q]   f32 (query scores)
    s2 = s2_ref[...]                                   # [blk_k, H]   f32 (key scores)

    # Key-validity bias (computed once per grid step), applied AFTER LeakyReLU so
    # padded key rows get exactly -1e30 -> softmax weight 0.
    if n_pad > n_valid:
        kv_idx = ki * blk_k + jax.lax.broadcasted_iota(jnp.int32, (blk_k, 1), 0)
        neg_bias = jnp.where(kv_idx < n_valid, 0.0, _MASK).astype(jnp.float32)
    else:
        neg_bias = None

    # Static head loop (H is small).  For H > 2 a lax.fori_loop would bound the
    # per-head live ranges; with H<=2 the static loop keeps lowering simple.
    for h in range(n_heads):
        # Transposed logits: eT[j, i] = leakyrelu(s2[j, h] + s1[i, h]).
        e = s2[:, h:h + 1] + s1t[h:h + 1, :]           # [blk_k, blk_q]
        e = jnp.where(e > 0, e, alpha * e)             # LeakyReLU (f32)
        if neg_bias is not None:
            e = e + neg_bias

        m_prev = m_sc[h]                               # [1, blk_q]
        m_new = jnp.maximum(m_prev, jnp.max(e, axis=0, keepdims=True))
        p = jnp.exp(e - m_new)                         # [blk_k, blk_q]
        corr = jnp.exp(m_prev - m_new)                 # [1, blk_q]
        l_sc[h] = corr * l_sc[h] + jnp.sum(p, axis=0, keepdims=True)

        # Per-head lane-dense value tile [F, blk_k] (bf16).
        if v_resident:
            k0 = pl.multiple_of(ki * blk_k, 128)
            v_h_t = vt_ref[h * F:(h + 1) * F, pl.ds(k0, blk_k)]
        else:
            v_h_t = vt_ref[h * F:(h + 1) * F, :]
        # Aggregation on the MXU: [F, blk_k] @ [blk_k, blk_q] -> [F, blk_q]
        # (output lane width = blk_q, bf16 operands, f32 accumulate).
        pv = jnp.dot(v_h_t, p.astype(v_h_t.dtype),
                     preferred_element_type=jnp.float32)
        acc_sc[h] = corr * acc_sc[h] + pv
        m_sc[h] = m_new

    @pl.when(ki == pl.num_programs(1) - 1)
    def _finalize():
        # Normalize once per query block (exact reciprocal: runs once, free) and
        # store lane-dense [F, blk_q] slabs directly (no concatenate).
        for h in range(n_heads):
            inv_l = pl.reciprocal(l_sc[h], approx=False)        # [1, blk_q]
            o_ref[h * F:(h + 1) * F, :] = (acc_sc[h] * inv_l).astype(o_ref.dtype)


# ----------------------------------------------------------------------------
# Wrapper mirroring GraphAttentionLayer.forward (eval mode)
# ----------------------------------------------------------------------------
def graph_attention_layer(x, adj, W, a, *, n_heads, out_features, alpha=0.2,
                          concat=True, block_q=512, block_k=1024,
                          value_dtype=jnp.bfloat16,
                          max_resident_bytes=12 * 1024 * 1024,
                          vmem_limit_bytes=32 * 1024 * 1024):
    """GAT forward (inference).

    x:   [N, in_features] f32
    adj: [N, N]  -- unused by the reference math (dense attention); parity only.
    W:   [in_features, n_heads * out_features]
    a:   [n_heads, 2 * out_features, 1]
    """
    del adj  # the reference forward only extracts (unused) edge indices
    N, f_in = x.shape
    H, F = n_heads, out_features
    HF = H * F

    # ---- parameter prep (parameter-sized XLA, done once) --------------------
    # Fold attention vectors into the projection: s1 = x @ (W.a1), s2 = x @ (W.a2)
    a1 = a[:, :F, 0]                                    # [H, F]
    a2 = a[:, F:, 0]                                    # [H, F]
    w_heads = W.reshape(f_in, H, F)
    wa = jnp.concatenate([jnp.einsum('khf,hf->kh', w_heads, a1),
                          jnp.einsum('khf,hf->kh', w_heads, a2)], axis=1)  # [f_in, 2H]

    # ---- tiling: blk_q | blk_k | n_pad, all multiples of 128 ----------------
    n_pad = _round_up(N, 128)
    blk_k = min(_round_up(block_k, 128), n_pad)
    while n_pad % blk_k:
        blk_k -= 128
    blk_q = min(_round_up(block_q, 128), blk_k)
    if n_pad >= 256:
        # Guarantee >= 2 query blocks so the "parallel" axis feeds both v7x cores.
        blk_q = min(blk_q, max(128, (n_pad // 2) // 128 * 128))
    while blk_k % blk_q:
        blk_q -= 128
    num_q, num_k = n_pad // blk_q, n_pad // blk_k

    x_p = jnp.pad(x.astype(jnp.float32), ((0, n_pad - N), (0, 0)))

    # ---- 1) projection kernel ------------------------------------------------
    v_flat, s = pl.pallas_call(
        gat_project_kernel,
        out_shape=(jax.ShapeDtypeStruct((n_pad, HF), value_dtype),
                   jax.ShapeDtypeStruct((n_pad, 2 * H), jnp.float32)),
        grid_spec=pltpu.PrefetchScalarGridSpec(
            num_scalar_prefetch=0,
            grid=(n_pad // blk_q,),
            in_specs=[pl.BlockSpec((blk_q, f_in), lambda i: (i, 0)),
                      pl.BlockSpec((f_in, HF), lambda i: (0, 0)),
                      pl.BlockSpec((f_in, 2 * H), lambda i: (0, 0))],
            out_specs=[pl.BlockSpec((blk_q, HF), lambda i: (i, 0)),
                       pl.BlockSpec((blk_q, 2 * H), lambda i: (i, 0))]),
        compiler_params=pltpu.CompilerParams(
            dimension_semantics=("parallel",),
            vmem_limit_bytes=vmem_limit_bytes),
    )(x_p, W.astype(jnp.bfloat16), wa.astype(jnp.float32))

    # ---- glue (O(N*HF) or smaller; no [H, N, F] lane-padded layout) ----------
    s1t = s[:, :H].T                                    # [H, n_pad]  query scores (lane-dense)
    s2 = s[:, H:]                                       # [n_pad, H]  key scores (sublane-major)
    vt = v_flat.T                                       # [HF, n_pad] bf16, lane-dense values

    v_bytes = n_pad * HF * jnp.dtype(value_dtype).itemsize
    v_resident = (2 * v_bytes) <= max_resident_bytes    # x2: double-buffer headroom
    if v_resident:
        # Full value matrix stays VMEM-resident (fetched once; index never changes).
        vt_spec = pl.BlockSpec((HF, n_pad), lambda qi, ki: (0, 0))
    else:
        vt_spec = pl.BlockSpec((HF, blk_k), lambda qi, ki: (0, ki))

    kernel = functools.partial(
        gat_attention_kernel, n_heads=H, out_features=F, blk_k=blk_k,
        alpha=alpha, n_valid=N, n_pad=n_pad, v_resident=v_resident)

    # ---- 2) flash-style attention kernel (transposed output [HF, n_pad]) -----
    out_t = pl.pallas_call(
        kernel,
        out_shape=jax.ShapeDtypeStruct((HF, n_pad), jnp.float32),
        grid_spec=pltpu.PrefetchScalarGridSpec(
            num_scalar_prefetch=0,
            grid=(num_q, num_k),                         # reduction (kv) axis last
            in_specs=[
                pl.BlockSpec((H, blk_q), lambda qi, ki: (0, qi)),    # s1t
                pl.BlockSpec((blk_k, H), lambda qi, ki: (ki, 0)),    # s2
                vt_spec,                                             # values^T
            ],
            out_specs=pl.BlockSpec((HF, blk_q), lambda qi, ki: (0, qi)),
            scratch_shapes=[
                pltpu.VMEM((H, 1, blk_q), jnp.float32),   # running max
                pltpu.VMEM((H, 1, blk_q), jnp.float32),   # running denominator
                pltpu.VMEM((H, F, blk_q), jnp.float32),   # unnormalized acc^T
            ]),
        compiler_params=pltpu.CompilerParams(
            dimension_semantics=("parallel", "arbitrary"),
            vmem_limit_bytes=vmem_limit_bytes),
    )(s1t, s2, vt)

    out = out_t.T[:N]                                   # [N, HF]
    if not concat:
        out = out.reshape(N, H, F).mean(axis=1)
    return out
    # TODO(synk): F.dropout on the attention matrix (training mode) is omitted;
    # this implements eval-mode semantics (dropout is identity at inference).


# ----------------------------------------------------------------------------
# Pure-JAX reference matching the PyTorch forward (eval mode)
# ----------------------------------------------------------------------------
def _reference(x, W, a, *, n_heads, out_features, alpha):
    N = x.shape[0]
    F = out_features
    h = (x @ W).reshape(N, n_heads, F)
    edge_h = jnp.concatenate(
        [jnp.broadcast_to(h[:, None, :, :], (N, N, n_heads, F)),
         jnp.broadcast_to(h[None, :, :, :], (N, N, n_heads, F))], axis=-1)
    e = jnp.einsum('ijhf,hfa->ijha', edge_h, a).squeeze(-1)
    e = jnp.where(e > 0, e, alpha * e)
    attn = jax.nn.softmax(e, axis=1)
    h_prime = jnp.einsum('ijh,jhf->ihf', attn, h)
    return h_prime.reshape(N, n_heads * F)


if __name__ == "__main__":
    # N deliberately NOT a multiple of the tile sizes so padding / key masking is
    # exercised.  Two configurations are run: (a) default tiling with the values
    # VMEM-resident, and (b) a 2x2 (query, kv) grid with HBM-streamed values so
    # the online-softmax accumulation across kv blocks and the streamed path are
    # exercised too.
    N = 200
    in_features = 16
    out_features = 32
    n_heads = 2
    alpha = 0.2

    key = jax.random.PRNGKey(0)
    kx, kadj, kw, ka = jax.random.split(key, 4)

    x = jax.random.normal(kx, (N, in_features), dtype=jnp.float32)
    adj = (jax.random.uniform(kadj, (N, N)) > 0.7).astype(jnp.float32)  # unused by the math

    # Deterministic Xavier-normal init (gain = calculate_gain('relu') = sqrt(2)).
    gain = math.sqrt(2.0)
    std_w = gain * math.sqrt(2.0 / (in_features + n_heads * out_features))
    W = std_w * jax.random.normal(kw, (in_features, n_heads * out_features),
                                  dtype=jnp.float32)
    std_a = gain * math.sqrt(2.0 / (2 * out_features + n_heads))
    a = std_a * jax.random.normal(ka, (n_heads, 2 * out_features, 1), dtype=jnp.float32)

    ref = _reference(x, W, a, n_heads=n_heads, out_features=out_features, alpha=alpha)

    # (a) default tiling, VMEM-resident values
    out_a = graph_attention_layer(
        x, adj, W, a, n_heads=n_heads, out_features=out_features, alpha=alpha,
        concat=True)
    out_a = jax.block_until_ready(out_a)
    assert out_a.shape == (N, n_heads * out_features)
    # bf16 values / probabilities in the aggregation matmul => ~1e-2-level
    # agreement with the pure-f32 reference; softmax math stays f32.
    assert jnp.allclose(out_a, ref, atol=5e-2, rtol=5e-2), "mismatch (resident path)"

    # (b) multi kv-block grid + HBM-streamed values
    out_b = graph_attention_layer(
        x, adj, W, a, n_heads=n_heads, out_features=out_features, alpha=alpha,
        concat=True, block_q=128, block_k=128, max_resident_bytes=0)
    out_b = jax.block_until_ready(out_b)
    assert jnp.allclose(out_b, ref, atol=5e-2, rtol=5e-2), "mismatch (streamed path)"

    print("KERNEL_OK")
</pallas_src>

<mosaic_0001>
module attributes {stable_mosaic.version = 11 : i64} {
  func.func @gat_project_kernel(%arg0: i32, %arg1: memref<128x16xf32, #tpu.memory_space<vmem>>, %arg2: memref<16x64xbf16, #tpu.memory_space<vmem>>, %arg3: memref<16x4xf32, #tpu.memory_space<vmem>>, %arg4: memref<128x64xbf16, #tpu.memory_space<vmem>>, %arg5: memref<128x4xf32, #tpu.memory_space<vmem>>) attributes {dimension_semantics = [#tpu.dimension_semantics<parallel>], iteration_bounds = array<i64: 2>, scalar_prefetch = 0 : i64, scratch_operands = 0 : i64, tpu.core_type = #tpu.core_type<tc>, window_params = [{transform_indices = @transform_0, window_bounds = array<i64: 128, 16>}, {pipeline_mode = #tpu.pipeline_mode<synchronous>, transform_indices = @transform_1, window_bounds = array<i64: 16, 64>}, {pipeline_mode = #tpu.pipeline_mode<synchronous>, transform_indices = @transform_2, window_bounds = array<i64: 16, 4>}, {transform_indices = @transform_3, window_bounds = array<i64: 128, 64>}, {transform_indices = @transform_4, window_bounds = array<i64: 128, 4>}]} {
    %c0 = arith.constant 0 : index
    %c0_0 = arith.constant 0 : index
    %0 = vector.load %arg1[%c0, %c0_0] : memref<128x16xf32, #tpu.memory_space<vmem>>, vector<128x16xf32>
    %1 = arith.truncf %0 : vector<128x16xf32> to vector<128x16xbf16>
    %c0_1 = arith.constant 0 : index
    %c0_2 = arith.constant 0 : index
    %2 = vector.load %arg2[%c0_1, %c0_2] : memref<16x64xbf16, #tpu.memory_space<vmem>>, vector<16x64xbf16>
    %cst = arith.constant dense<0.000000e+00> : vector<128x64xf32>
    %3 = tpu.matmul %1, %2, %cst {dimension_numbers = #tpu.dot_dimension_numbers<[1], [0], [0], [1], [0, 0, 1, 1], [], []>} : vector<128x16xbf16>, vector<16x64xbf16>, vector<128x64xf32> -> vector<128x64xf32>
    %4 = arith.truncf %3 : vector<128x64xf32> to vector<128x64xbf16>
    %c0_3 = arith.constant 0 : index
    %c0_4 = arith.constant 0 : index
    %5 = vector.load %arg4[%c0_3, %c0_4] : memref<128x64xbf16, #tpu.memory_space<vmem>>, vector<128x64xbf16>
    tpu.vector_store %arg4[%c0_3, %c0_4], %4 {strides = array<i32>} : memref<128x64xbf16, #tpu.memory_space<vmem>>, vector<128x64xbf16>,
    %c0_5 = arith.constant 0 : index
    %c0_6 = arith.constant 0 : index
    %6 = vector.load %arg3[%c0_5, %c0_6] : memref<16x4xf32, #tpu.memory_space<vmem>>, vector<16x4xf32>
    %cst_7 = arith.constant dense<0.000000e+00> : vector<128x4xf32>
    %7 = tpu.matmul %0, %6, %cst_7 {dimension_numbers = #tpu.dot_dimension_numbers<[1], [0], [0], [1], [0, 0, 1, 1], [], []>} : vector<128x16xf32>, vector<16x4xf32>, vector<128x4xf32> -> vector<128x4xf32>
    %c0_8 = arith.constant 0 : index
    %c0_9 = arith.constant 0 : index
    %8 = vector.load %arg5[%c0_8, %c0_9] : memref<128x4xf32, #tpu.memory_space<vmem>>, vector<128x4xf32>
    tpu.vector_store %arg5[%c0_8, %c0_9], %7 {strides = array<i32>} : memref<128x4xf32, #tpu.memory_space<vmem>>, vector<128x4xf32>,
    return
  }
  func.func @transform_0(%arg0: i32) -> (i32, i32) {
    %c0_i32 = arith.constant 0 : i32
    %c0_i32_0 = arith.constant 0 : i32
    return %arg0, %c0_i32 : i32, i32
  }
  func.func @transform_1(%arg0: i32) -> (i32, i32) {
    %c0_i32 = arith.constant 0 : i32
    %c0_i32_0 = arith.constant 0 : i32
    %c0_i32_1 = arith.constant 0 : i32
    return %c0_i32, %c0_i32_0 : i32, i32
  }
  func.func @transform_2(%arg0: i32) -> (i32, i32) {
    %c0_i32 = arith.constant 0 : i32
    %c0_i32_0 = arith.constant 0 : i32
    %c0_i32_1 = arith.constant 0 : i32
    return %c0_i32, %c0_i32_0 : i32, i32
  }
  func.func @transform_3(%arg0: i32) -> (i32, i32) {
    %c0_i32 = arith.constant 0 : i32
    %c0_i32_0 = arith.constant 0 : i32
    return %arg0, %c0_i32 : i32, i32
  }
  func.func @transform_4(%arg0: i32) -> (i32, i32) {
    %c0_i32 = arith.constant 0 : i32
    %c0_i32_0 = arith.constant 0 : i32
    return %arg0, %c0_i32 : i32, i32
  }
}

</mosaic_0001>

<bundles_post_ra>
// kernel: tpu_custom_call.1
= control target key start
LH: loop header
LB: loop body
LE: loop exit
PB: predicated region body
PF: predicated region fallthrough
CT: control target
= control target key end

     0   :  { %s942_s15 = smov 0   ;;  %s1089_s0 = inlined_call_operand.vmem [shape: f32[256,16], index: 0, kind: input, shape index: {}]   ;;  %s1090_s1 = inlined_call_operand.vmem [shape: bf16[16,64], index: 1, kind: input, shape index: {}]   ;;  %s1091_s2 = inlined_call_operand.vmem [shape: f32[16,4], index: 2, kind: input, shape index: {}]   ;;  %s1092_s3 = inlined_call_operand.vmem [shape: bf16[256,64], index: 3, kind: output, shape index: {0}]   ;;  %s1093_s4 = inlined_call_operand.vmem [shape: f32[256,4], index: 4, kind: output, shape index: {1}]  }
   0x1 LB: > { %s753_s16 = sadd.s32 4294967295, %s915_s15   ;;  %p757_p0 = scmp.ge.s32.totalorder %s915_s15, 1  ;;  %s915_s15 = sphi %s942_s15, %s15_s15  }
   0x2   : > { %p166_p1 = scmp.lt.s32.totalorder %s915_s15, 3 }
   0x4   : > { %p167_p2 = pnand %p757_p0, %p166_p1 }
   0x5   : > { %v451_v0 = vld [vmem:[%s1091_s2] sm:$0xff] (!%p167_p2)  ;;  %v452_v1 = vld [vmem:[%s1091_s2 + $0x8] sm:$0xff] (!%p167_p2)  ;;  %s758_s21 = sshll.u32 (!%p167_p2), %s753_s16, 4  ;;  %vm248_vm0 = vcmask (!%p167_p2), 130048   ;;  %vm646_vm1 = vcmask (!%p167_p2), 31744   ;;  %vm434_vm2 = vcmask (!%p167_p2), 519168  }
   0x6   : > { %170 = sbr.rel (%p167_p2) target bundleno = 262 (0x106), region = 32  ;;  %v896_v2 = vpack.c.bf16 (!%p167_p2), %v452_v1, %v451_v0  ;;  %v908_v3 = vld [vmem:[%s1090_s1] sm:$0xff] (!%p167_p2)   ;;  %p198_p3 = scmp.lt.s32.totalorder (!%p167_p2), %s758_s21, 31 }
   0x7   : > { %850 = vmatprep.subr.bf16.mxu0 (!%p167_p2), %v908_v3 }
   0x8   : > { %897 = vmatprep.subr.bf16.mxu1 (!%p167_p2), %v896_v2  ;;  %851 = vmatpush3.bf16.msra.mxu0 (!%p167_p2), %v908_v3 }
   0x9   : > { %899 = vmatpush3.bf16.msra.mxu1 (!%p167_p2), %v896_v2 }
   0xd   : > { %s1095_s21 = smov (!%p198_p3, %s758_s21), 31 }
   0xe   : > { %s759_s24 = sshll.u32 %s1095_s21, 3  ;;  %s761_s5 = sshll.u32 %s1095_s21, 2 }
   0xf   : > { %s967_s27 = scalar_lea.vmem %s1089_s0, %s759_s24  ;;  %s1014_s30 = scalar_lea.vmem %s1093_s4, %s759_s24 }
  0x10   : > { %v216_v4 = vld [vmem:[%s967_s27] sm:$0xff]  ;;  %v217_v5 = vld [vmem:[%s967_s27 + $0x8] sm:$0xff]  ;;  %v218_v6 = vld [vmem:[%s967_s27 + $0x10] sm:$0xff]  ;;  %s1022_s8 = scalar_lea.vmem %s1092_s3, %s761_s5 }
  0x11   : > { %872 = vmatprep.mubr.msk.f32.mxu1 %vm248_vm0, %v216_v4  ;;  %v232_v7 = vpack.c.bf16 %v217_v5, %v216_v4  ;;  %v219_v8 = vld [vmem:[%s967_s27 + $0x18] sm:$0xff]  ;;  %v220_v9 = vld [vmem:[%s967_s27 + $0x20] sm:$0xff]  ;;  %v221_v10 = vld [vmem:[%s967_s27 + $0x28] sm:$0xff] }
  0x12   : > { %873 = vmatmul.mubr.msk.f32.vlgmr.msra.gmra.mrb[0].mxu1 %vm248_vm0, %v217_v5  ;;  %v233_v11 = vpack.c.bf16 %v219_v8, %v218_v6  ;;  %v234_v12 = vpack.c.bf16 %v221_v10, %v220_v9  ;;  %v222_v13 = vld [vmem:[%s967_s27 + $0x30] sm:$0xff]  ;;  %v223_v14 = vld [vmem:[%s967_s27 + $0x38] sm:$0xff]  ;;  %v224_v15 = vld [vmem:[%s967_s27 + $0x40] sm:$0xff] }
  0x13   : > { %852 = vmatprep.mubr.msk.bf16.mxu0 %vm248_vm0, %v232_v7  ;;  %875 = vmatprep.mubr.msk.f32.mxu1 %vm248_vm0, %v218_v6  ;;  %v225_v16 = vld [vmem:[%s967_s27 + $0x48] sm:$0xff]  ;;  %v235_v17 = vpack.c.bf16 %v223_v14, %v222_v13  ;;  %v226_v19 = vld [vmem:[%s967_s27 + $0x50] sm:$0xff]  ;;  %v227_v20 = vld [vmem:[%s967_s27 + $0x58] sm:$0xff] }
  0x14   : > { %853 = vmatmul.mubr.msk.bf16.vlgmr.msra.gmra.mrb[0].mxu0 %vm248_vm0, %v233_v11  ;;  %v236_v18 = vpack.c.bf16 %v225_v16, %v224_v15  ;;  %v228_v21 = vld [vmem:[%s967_s27 + $0x60] sm:$0xff]  ;;  %v229_v22 = vld [vmem:[%s967_s27 + $0x68] sm:$0xff]  ;;  %v237_v23 = vpack.c.bf16 %v227_v20, %v226_v19  ;;  %v230_v25 = vld [vmem:[%s967_s27 + $0x70] sm:$0xff] }
  0x15   : > { %856 = vmatprep.mubr.msk.bf16.mxu0 %vm248_vm0, %v234_v12  ;;  %v238_v24 = vpack.c.bf16 %v229_v22, %v228_v21  ;;  %v231_v26 = vld [vmem:[%s967_s27 + $0x78] sm:$0xff] }
  0x16   : > { %876 = vmatmul.mubr.msk.f32.gmra.mrb[2].mxu1 %vm248_vm0, %v219_v8  ;;  %v239_v27 = vpack.c.bf16 %v231_v26, %v230_v25 }
  0x17   : > { %878 = vmatprep.mubr.msk.f32.mxu1 %vm248_vm0, %v220_v9 }
  0x1a   : > { %879 = vmatmul.mubr.msk.f32.gmra.mrb[4].mxu1 %vm248_vm0, %v221_v10 }
  0x1b   : > { %881 = vmatprep.mubr.msk.f32.mxu1 %vm248_vm0, %v222_v13 }
  0x1c   : > { %857 = vmatmul.mubr.msk.bf16.gmra.mrb[4].mxu0 %vm248_vm0, %v235_v17 }
  0x1d   : > { %860 = vmatprep.mubr.msk.bf16.mxu0 %vm248_vm0, %v236_v18 }
  0x1e   : > { %882 = vmatmul.mubr.msk.f32.gmra.mrb[6].mxu1 %vm248_vm0, %v223_v14 }
  0x1f   : > { %884 = vmatprep.mubr.msk.f32.mxu1 %vm248_vm0, %v224_v15 }
  0x22   : > { %885 = vmatmul.mubr.msk.f32.gmra.mrb[8].mxu1 %vm248_vm0, %v225_v16 }
  0x23   : > { %887 = vmatprep.mubr.msk.f32.mxu1 %vm248_vm0, %v226_v19 }
  0x24   : > { %861 = vmatmul.mubr.msk.bf16.gmra.mrb[8].mxu0 %vm248_vm0, %v237_v23 }
  0x25   : > { %864 = vmatprep.mubr.msk.bf16.mxu0 %vm248_vm0, %v238_v24 }
  0x26   : > { %888 = vmatmul.mubr.msk.f32.gmra.mrb[10].mxu1 %vm248_vm0, %v227_v20 }
  0x27   : > { %890 = vmatprep.mubr.msk.f32.mxu1 %vm248_vm0, %v228_v21 }
  0x2a   : > { %891 = vmatmul.mubr.msk.f32.gmra.mrb[12].mxu1 %vm248_vm0, %v229_v22 }
  0x2b   : > { %893 = vmatprep.mubr.msk.f32.mxu1 %vm248_vm0, %v230_v25 }
  0x2c   : > { %865 = vmatmul.mubr.msk.bf16.gmra.mrb[12].mxu0 %vm248_vm0, %v239_v27 }
  0x2e   : > { %894 = vmatmul.mubr.msk.f32.gmra.mrb[14].mxu1 %vm248_vm0, %v231_v26 }
  0xe5   : > { %v874_v28 = vpop.f32.mrb[0].mxu1 }
  0xe6   : > { %648 = vst.msk [vmem:[%s1014_s30 + $0x8] sm:$0xff] %vm646_vm1, %v874_v28  ;;  %v567_v29 = vpop.f32.mrb[1].mxu1 }
  0xe7   : > { %v854_v30 = vpop.f32.mrb[0].mxu0  ;;  %647 = vst.msk [vmem:[%s1014_s30] sm:$0xff] %vm646_vm1, %v567_v29 }
  0xe8   : > { %v809_v31 = vpack.c.bf16 %v854_v30, %v854_v30  ;;  %v307_v32 = vpop.f32.mrb[1].mxu0 }
  0xe9   : > { %v807_v33 = vpack.c.bf16 %v307_v32, %v307_v32  ;;  %v855_v34 = vpop.f32.mrb[2].mxu0  ;;  %v877_v35 = vpop.f32.mrb[2].mxu1 }
  0xea   : > { %437 = vst.msk [vmem:[%s1022_s8 + $0x8] sm:$0xf] %vm434_vm2, %v809_v31  ;;  %v810_v36 = vpack.c.bf16 %v855_v34, %v855_v34  ;;  %v310_v37 = vpop.f32.mrb[3].mxu0  ;;  %v577_v38 = vpop.f32.mrb[3].mxu1 }
  0xeb   : > { %650 = vst.msk [vmem:[%s1014_s30 + $0x18] sm:$0xff] %vm646_vm1, %v877_v35  ;;  %v808_v39 = vpack.c.bf16 %v310_v37, %v310_v37  ;;  %649 = vst.msk [vmem:[%s1014_s30 + $0x10] sm:$0xff] %vm646_vm1, %v577_v38 }
  0xec   : > { %435 = vst.msk [vmem:[%s1022_s8] sm:$0xf] %vm434_vm2, %v807_v33  ;;  %438 = vst.msk [vmem:[%s1022_s8 + $0xc] sm:$0xf] %vm434_vm2, %v810_v36 }
  0xed   : > { %436 = vst.msk [vmem:[%s1022_s8 + $0x4] sm:$0xf] %vm434_vm2, %v808_v39  ;;  %v880_v40 = vpop.f32.mrb[4].mxu1 }
  0xee   : > { %652 = vst.msk [vmem:[%s1014_s30 + $0x28] sm:$0xff] %vm646_vm1, %v880_v40  ;;  %v587_v41 = vpop.f32.mrb[5].mxu1 }
  0xef   : > { %v858_v42 = vpop.f32.mrb[4].mxu0  ;;  %651 = vst.msk [vmem:[%s1014_s30 + $0x20] sm:$0xff] %vm646_vm1, %v587_v41 }
  0xf0   : > { %v813_v43 = vpack.c.bf16 %v858_v42, %v858_v42  ;;  %v323_v44 = vpop.f32.mrb[5].mxu0 }
  0xf1   : > { %v811_v45 = vpack.c.bf16 %v323_v44, %v323_v44  ;;  %v859_v46 = vpop.f32.mrb[6].mxu0  ;;  %v883_v47 = vpop.f32.mrb[6].mxu1 }
  0xf2   : > { %441 = vst.msk [vmem:[%s1022_s8 + $0x18] sm:$0xf] %vm434_vm2, %v813_v43  ;;  %v814_v48 = vpack.c.bf16 %v859_v46, %v859_v46  ;;  %v326_v49 = vpop.f32.mrb[7].mxu0  ;;  %v597_v50 = vpop.f32.mrb[7].mxu1 }
  0xf3   : > { %654 = vst.msk [vmem:[%s1014_s30 + $0x38] sm:$0xff] %vm646_vm1, %v883_v47  ;;  %v812_v51 = vpack.c.bf16 %v326_v49, %v326_v49  ;;  %653 = vst.msk [vmem:[%s1014_s30 + $0x30] sm:$0xff] %vm646_vm1, %v597_v50 }
  0xf4   : > { %439 = vst.msk [vmem:[%s1022_s8 + $0x10] sm:$0xf] %vm434_vm2, %v811_v45  ;;  %442 = vst.msk [vmem:[%s1022_s8 + $0x1c] sm:$0xf] %vm434_vm2, %v814_v48 }
  0xf5   : > { %440 = vst.msk [vmem:[%s1022_s8 + $0x14] sm:$0xf] %vm434_vm2, %v812_v51  ;;  %v886_v52 = vpop.f32.mrb[8].mxu1 }
  0xf6   : > { %656 = vst.msk [vmem:[%s1014_s30 + $0x48] sm:$0xff] %vm646_vm1, %v886_v52  ;;  %v607_v53 = vpop.f32.mrb[9].mxu1 }
  0xf7   : > { %v862_v54 = vpop.f32.mrb[8].mxu0  ;;  %655 = vst.msk [vmem:[%s1014_s30 + $0x40] sm:$0xff] %vm646_vm1, %v607_v53 }
  0xf8   : > { %v817_v55 = vpack.c.bf16 %v862_v54, %v862_v54  ;;  %v339_v56 = vpop.f32.mrb[9].mxu0 }
  0xf9   : > { %v815_v57 = vpack.c.bf16 %v339_v56, %v339_v56  ;;  %v863_v58 = vpop.f32.mrb[10].mxu0  ;;  %v889_v59 = vpop.f32.mrb[10].mxu1 }
  0xfa   : > { %445 = vst.msk [vmem:[%s1022_s8 + $0x28] sm:$0xf] %vm434_vm2, %v817_v55  ;;  %v818_v60 = vpack.c.bf16 %v863_v58, %v863_v58  ;;  %v342_v61 = vpop.f32.mrb[11].mxu0  ;;  %v617_v62 = vpop.f32.mrb[11].mxu1 }
  0xfb   : > { %658 = vst.msk [vmem:[%s1014_s30 + $0x58] sm:$0xff] %vm646_vm1, %v889_v59  ;;  %v816_v63 = vpack.c.bf16 %v342_v61, %v342_v61  ;;  %657 = vst.msk [vmem:[%s1014_s30 + $0x50] sm:$0xff] %vm646_vm1, %v617_v62 }
  0xfc   : > { %443 = vst.msk [vmem:[%s1022_s8 + $0x20] sm:$0xf] %vm434_vm2, %v815_v57  ;;  %446 = vst.msk [vmem:[%s1022_s8 + $0x2c] sm:$0xf] %vm434_vm2, %v818_v60 }
  0xfd   : > { %444 = vst.msk [vmem:[%s1022_s8 + $0x24] sm:$0xf] %vm434_vm2, %v816_v63  ;;  %v892_v0 = vpop.f32.mrb[12].mxu1 }
  0xfe   : > { %660 = vst.msk [vmem:[%s1014_s30 + $0x68] sm:$0xff] %vm646_vm1, %v892_v0  ;;  %v627_v1 = vpop.f32.mrb[13].mxu1 }
  0xff   : > { %v866_v2 = vpop.f32.mrb[12].mxu0  ;;  %659 = vst.msk [vmem:[%s1014_s30 + $0x60] sm:$0xff] %vm646_vm1, %v627_v1 }
 0x100   : > { %v821_v3 = vpack.c.bf16 %v866_v2, %v866_v2  ;;  %v355_v4 = vpop.f32.mrb[13].mxu0 }
 0x101   : > { %v819_v5 = vpack.c.bf16 %v355_v4, %v355_v4  ;;  %v867_v6 = vpop.f32.mrb[14].mxu0  ;;  %v895_v7 = vpop.f32.mrb[14].mxu1 }
 0x102   : > { %449 = vst.msk [vmem:[%s1022_s8 + $0x38] sm:$0xf] %vm434_vm2, %v821_v3  ;;  %v822_v8 = vpack.c.bf16 %v867_v6, %v867_v6  ;;  %v358_v9 = vpop.f32.mrb[15].mxu0  ;;  %v637_v10 = vpop.f32.mrb[15].mxu1 }
 0x103   : > { %662 = vst.msk [vmem:[%s1014_s30 + $0x78] sm:$0xff] %vm646_vm1, %v895_v7  ;;  %v820_v11 = vpack.c.bf16 %v358_v9, %v358_v9  ;;  %661 = vst.msk [vmem:[%s1014_s30 + $0x70] sm:$0xff] %vm646_vm1, %v637_v10 }
 0x104   : > { %447 = vst.msk [vmem:[%s1022_s8 + $0x30] sm:$0xf] %vm434_vm2, %v819_v5  ;;  %450 = vst.msk [vmem:[%s1022_s8 + $0x3c] sm:$0xf] %vm434_vm2, %v822_v8 }
 0x105   : > { %448 = vst.msk [vmem:[%s1022_s8 + $0x34] sm:$0xf] %vm434_vm2, %v820_v11 }
 0x106 PF: > { %s15_s15 = sadd.s32 1, %s915_s15  }
 0x107   : > { %p12_p4 = scmp.ge.s32.totalorder %s15_s15, 4  }
 0x109   :  { %14 = sbr.rel (!%p12_p4) target bundleno = 1 (0x1), region = 74 }

</bundles_post_ra>
